<compile_context>
chip_gen: v7x
topology: tpu7x:2x2x1
jax: 0.10.0
libtpu: 0.0.40
codegen_flags: <defaults>
</compile_context>

<pallas_src>
import jax
import jax.numpy as jnp
from jax.experimental import pallas as pl
from jax.experimental.pallas import tpu as pltpu

NUM_FEATURES = 32
NUM_CLASSES = 4
H1 = 128
H2 = 64
H2_PAD = 128     # pad hidden 64 -> 128 so K/N dims are lane-dense
OUT_PAD = 128    # pad 4 logits -> 128 lanes for dense, unmasked stores
BN_EPS = 1e-5


def dnn_kernel(x_ref, w1_ref, b1_ref, w2_ref, b2_ref, w3_ref, b3_ref, out_ref):
    # BN already folded into (w1, b1) by the wrapper.
    x = x_ref[...].astype(jnp.bfloat16)                                  # (TB, 32)
    h1 = jnp.dot(x, w1_ref[...], preferred_element_type=jnp.float32) + b1_ref[...]
    h2 = jnp.dot(h1.astype(jnp.bfloat16), w2_ref[...],
                 preferred_element_type=jnp.float32) + b2_ref[...]
    # MultiSampleDropout(fc3): dropout is identity at inference, so the mean over
    # 4 identical fc3 passes collapses to a single fc3 application.
    logits = jnp.dot(h2.astype(jnp.bfloat16), w3_ref[...],
                     preferred_element_type=jnp.float32) + b3_ref[...]
    out_ref[...] = logits                                                # (TB, 128)


def _round_up(x, m):
    return ((x + m - 1) // m) * m


def dnn_forward(x, params, tb=256):
    """x: (B, NUM_FEATURES) f32. params: transposed (in, out) weights + BN stats."""
    B, F = x.shape
    assert F == NUM_FEATURES
    gamma, beta, rmean, rvar, w1, b1, w2, b2, w3, b3 = params

    # ---- Fold eval-mode BatchNorm1d into fc1 (exact at inference) ----
    scale = gamma * jax.lax.rsqrt(rvar + BN_EPS)            # (1, F)
    shift = beta - rmean * scale                            # (1, F)
    w1_f = scale.reshape(F, 1) * w1                         # (F, H1)
    b1_f = b1 + shift @ w1                                  # (1, H1)

    # ---- Pad H2 (64->128) and logits (4->128) to lane-dense widths ----
    w2_p = jnp.pad(w2, ((0, 0), (0, H2_PAD - H2)))
    b2_p = jnp.pad(b2, ((0, 0), (0, H2_PAD - H2)))
    w3_p = jnp.pad(w3, ((0, H2_PAD - H2), (0, OUT_PAD - NUM_CLASSES)))
    b3_p = jnp.pad(b3, ((0, 0), (0, OUT_PAD - NUM_CLASSES)))

    # bf16 weights: full-rate MXU on v6e/v7x, halved weight traffic; f32 accumulation.
    w1_bf = w1_f.astype(jnp.bfloat16)
    w2_bf = w2_p.astype(jnp.bfloat16)
    w3_bf = w3_p.astype(jnp.bfloat16)

    # ---- Batch tiling (sized well within v7x's 64 MiB VMEM even double-buffered) ----
    tb = _round_up(min(tb, _round_up(B, 8)), 8)
    b_pad = _round_up(B, tb)
    x_p = x if b_pad == B else jnp.pad(x, ((0, b_pad - B), (0, 0)))
    grid_b = b_pad // tb

    in_specs = [
        pl.BlockSpec((tb, NUM_FEATURES), lambda i: (i, 0)),     # x: tiled over batch
        pl.BlockSpec((NUM_FEATURES, H1), lambda i: (0, 0)),     # weights: resident
        pl.BlockSpec((1, H1), lambda i: (0, 0)),
        pl.BlockSpec((H1, H2_PAD), lambda i: (0, 0)),
        pl.BlockSpec((1, H2_PAD), lambda i: (0, 0)),
        pl.BlockSpec((H2_PAD, OUT_PAD), lambda i: (0, 0)),
        pl.BlockSpec((1, OUT_PAD), lambda i: (0, 0)),
    ]
    out_spec = pl.BlockSpec((tb, OUT_PAD), lambda i: (i, 0))

    out_padded = pl.pallas_call(
        dnn_kernel,
        out_shape=jax.ShapeDtypeStruct((b_pad, OUT_PAD), jnp.float32),
        grid_spec=pl.GridSpec(
            grid=(grid_b,),
            in_specs=in_specs,
            out_specs=out_spec,
        ),
        compiler_params=pltpu.CompilerParams(
            dimension_semantics=("parallel",)),   # lets v7x shard batch tiles over 2 TCs
    )(x_p, w1_bf, b1_f, w2_bf, b2_p, w3_bf, b3_p)

    return out_padded[:B, :NUM_CLASSES]


def init_params(key):
    k1, k2, k3 = jax.random.split(key, 3)
    # BatchNorm1d fresh-module defaults (running stats).
    gamma = jnp.ones((1, NUM_FEATURES), jnp.float32)
    beta = jnp.zeros((1, NUM_FEATURES), jnp.float32)
    rmean = jnp.zeros((1, NUM_FEATURES), jnp.float32)
    rvar = jnp.ones((1, NUM_FEATURES), jnp.float32)
    # Linear layers stored transposed as (in, out).
    w1 = jax.random.normal(k1, (NUM_FEATURES, H1), jnp.float32) * 0.05
    b1 = jnp.full((1, H1), 0.01, jnp.float32)
    w2 = jax.random.normal(k2, (H1, H2), jnp.float32) * 0.05
    b2 = jnp.full((1, H2), 0.01, jnp.float32)
    w3 = jax.random.normal(k3, (H2, NUM_CLASSES), jnp.float32) * 0.05
    b3 = jnp.full((1, NUM_CLASSES), 0.01, jnp.float32)
    return (gamma, beta, rmean, rvar, w1, b1, w2, b2, w3, b3)


if __name__ == "__main__":
    key = jax.random.PRNGKey(0)
    kx, kp = jax.random.split(key)
    B = 8
    x = jax.random.normal(kx, (B, NUM_FEATURES), jnp.float32)
    params = init_params(kp)

    out = dnn_forward(x, params)
    jax.block_until_ready(out)
    assert out.shape == (B, NUM_CLASSES)
    print("KERNEL_OK")
</pallas_src>

<mosaic_0001>
module attributes {stable_mosaic.version = 11 : i64} {
  func.func @dnn_kernel(%arg0: i32, %arg1: memref<8x32xf32, #tpu.memory_space<vmem>>, %arg2: memref<32x128xbf16, #tpu.memory_space<vmem>>, %arg3: memref<1x128xf32, #tpu.memory_space<vmem>>, %arg4: memref<128x128xbf16, #tpu.memory_space<vmem>>, %arg5: memref<1x128xf32, #tpu.memory_space<vmem>>, %arg6: memref<128x128xbf16, #tpu.memory_space<vmem>>, %arg7: memref<1x128xf32, #tpu.memory_space<vmem>>, %arg8: memref<8x128xf32, #tpu.memory_space<vmem>>) attributes {dimension_semantics = [#tpu.dimension_semantics<parallel>], iteration_bounds = array<i64: 1>, scalar_prefetch = 0 : i64, scratch_operands = 0 : i64, tpu.core_type = #tpu.core_type<tc>, window_params = [{transform_indices = @transform_0, window_bounds = array<i64: 8, 32>}, {pipeline_mode = #tpu.pipeline_mode<synchronous>, transform_indices = @transform_1, window_bounds = array<i64: 32, 128>}, {pipeline_mode = #tpu.pipeline_mode<synchronous>, transform_indices = @transform_2, window_bounds = array<i64: 1, 128>}, {pipeline_mode = #tpu.pipeline_mode<synchronous>, transform_indices = @transform_3, window_bounds = array<i64: 128, 128>}, {pipeline_mode = #tpu.pipeline_mode<synchronous>, transform_indices = @transform_4, window_bounds = array<i64: 1, 128>}, {pipeline_mode = #tpu.pipeline_mode<synchronous>, transform_indices = @transform_5, window_bounds = array<i64: 128, 128>}, {pipeline_mode = #tpu.pipeline_mode<synchronous>, transform_indices = @transform_6, window_bounds = array<i64: 1, 128>}, {transform_indices = @transform_7, window_bounds = array<i64: 8, 128>}]} {
    %c0 = arith.constant 0 : index
    %c0_0 = arith.constant 0 : index
    %0 = vector.load %arg1[%c0, %c0_0] : memref<8x32xf32, #tpu.memory_space<vmem>>, vector<8x32xf32>
    %1 = arith.truncf %0 : vector<8x32xf32> to vector<8x32xbf16>
    %c0_1 = arith.constant 0 : index
    %c0_2 = arith.constant 0 : index
    %2 = vector.load %arg2[%c0_1, %c0_2] : memref<32x128xbf16, #tpu.memory_space<vmem>>, vector<32x128xbf16>
    %cst = arith.constant dense<0.000000e+00> : vector<8x128xf32>
    %3 = tpu.matmul %1, %2, %cst {dimension_numbers = #tpu.dot_dimension_numbers<[1], [0], [0], [1], [0, 0, 1, 1], [], []>} : vector<8x32xbf16>, vector<32x128xbf16>, vector<8x128xf32> -> vector<8x128xf32>
    %c0_3 = arith.constant 0 : index
    %c0_4 = arith.constant 0 : index
    %4 = vector.load %arg3[%c0_3, %c0_4] : memref<1x128xf32, #tpu.memory_space<vmem>>, vector<1x128xf32>
    %5 = vector.broadcast %4 : vector<1x128xf32> to vector<8x128xf32>
    %6 = arith.addf %3, %5 : vector<8x128xf32>
    %7 = arith.truncf %6 : vector<8x128xf32> to vector<8x128xbf16>
    %c0_5 = arith.constant 0 : index
    %c0_6 = arith.constant 0 : index
    %8 = vector.load %arg4[%c0_5, %c0_6] : memref<128x128xbf16, #tpu.memory_space<vmem>>, vector<128x128xbf16>
    %cst_7 = arith.constant dense<0.000000e+00> : vector<8x128xf32>
    %9 = tpu.matmul %7, %8, %cst_7 {dimension_numbers = #tpu.dot_dimension_numbers<[1], [0], [0], [1], [0, 0, 1, 1], [], []>} : vector<8x128xbf16>, vector<128x128xbf16>, vector<8x128xf32> -> vector<8x128xf32>
    %c0_8 = arith.constant 0 : index
    %c0_9 = arith.constant 0 : index
    %10 = vector.load %arg5[%c0_8, %c0_9] : memref<1x128xf32, #tpu.memory_space<vmem>>, vector<1x128xf32>
    %11 = vector.broadcast %10 : vector<1x128xf32> to vector<8x128xf32>
    %12 = arith.addf %9, %11 : vector<8x128xf32>
    %13 = arith.truncf %12 : vector<8x128xf32> to vector<8x128xbf16>
    %c0_10 = arith.constant 0 : index
    %c0_11 = arith.constant 0 : index
    %14 = vector.load %arg6[%c0_10, %c0_11] : memref<128x128xbf16, #tpu.memory_space<vmem>>, vector<128x128xbf16>
    %cst_12 = arith.constant dense<0.000000e+00> : vector<8x128xf32>
    %15 = tpu.matmul %13, %14, %cst_12 {dimension_numbers = #tpu.dot_dimension_numbers<[1], [0], [0], [1], [0, 0, 1, 1], [], []>} : vector<8x128xbf16>, vector<128x128xbf16>, vector<8x128xf32> -> vector<8x128xf32>
    %c0_13 = arith.constant 0 : index
    %c0_14 = arith.constant 0 : index
    %16 = vector.load %arg7[%c0_13, %c0_14] : memref<1x128xf32, #tpu.memory_space<vmem>>, vector<1x128xf32>
    %17 = vector.broadcast %16 : vector<1x128xf32> to vector<8x128xf32>
    %18 = arith.addf %15, %17 : vector<8x128xf32>
    %c0_15 = arith.constant 0 : index
    %c0_16 = arith.constant 0 : index
    %19 = vector.load %arg8[%c0_15, %c0_16] : memref<8x128xf32, #tpu.memory_space<vmem>>, vector<8x128xf32>
    tpu.vector_store %arg8[%c0_15, %c0_16], %18 {strides = array<i32>} : memref<8x128xf32, #tpu.memory_space<vmem>>, vector<8x128xf32>,
    return
  }
  func.func @transform_0(%arg0: i32) -> (i32, i32) {
    %c0_i32 = arith.constant 0 : i32
    %c0_i32_0 = arith.constant 0 : i32
    return %arg0, %c0_i32 : i32, i32
  }
  func.func @transform_1(%arg0: i32) -> (i32, i32) {
    %c0_i32 = arith.constant 0 : i32
    %c0_i32_0 = arith.constant 0 : i32
    %c0_i32_1 = arith.constant 0 : i32
    return %c0_i32, %c0_i32_0 : i32, i32
  }
  func.func @transform_2(%arg0: i32) -> (i32, i32) {
    %c0_i32 = arith.constant 0 : i32
    %c0_i32_0 = arith.constant 0 : i32
    %c0_i32_1 = arith.constant 0 : i32
    return %c0_i32, %c0_i32_0 : i32, i32
  }
  func.func @transform_3(%arg0: i32) -> (i32, i32) {
    %c0_i32 = arith.constant 0 : i32
    %c0_i32_0 = arith.constant 0 : i32
    %c0_i32_1 = arith.constant 0 : i32
    return %c0_i32, %c0_i32_0 : i32, i32
  }
  func.func @transform_4(%arg0: i32) -> (i32, i32) {
    %c0_i32 = arith.constant 0 : i32
    %c0_i32_0 = arith.constant 0 : i32
    %c0_i32_1 = arith.constant 0 : i32
    return %c0_i32, %c0_i32_0 : i32, i32
  }
  func.func @transform_5(%arg0: i32) -> (i32, i32) {
    %c0_i32 = arith.constant 0 : i32
    %c0_i32_0 = arith.constant 0 : i32
    %c0_i32_1 = arith.constant 0 : i32
    return %c0_i32, %c0_i32_0 : i32, i32
  }
  func.func @transform_6(%arg0: i32) -> (i32, i32) {
    %c0_i32 = arith.constant 0 : i32
    %c0_i32_0 = arith.constant 0 : i32
    %c0_i32_1 = arith.constant 0 : i32
    return %c0_i32, %c0_i32_0 : i32, i32
  }
  func.func @transform_7(%arg0: i32) -> (i32, i32) {
    %c0_i32 = arith.constant 0 : i32
    %c0_i32_0 = arith.constant 0 : i32
    return %arg0, %c0_i32 : i32, i32
  }
}

</mosaic_0001>

<bundles_post_ra>
// kernel: tpu_custom_call.1
= control target key start
LH: loop header
LB: loop body
LE: loop exit
PB: predicated region body
PF: predicated region fallthrough
CT: control target
= control target key end

     0   :  { %12 = vsyncpa [#allocation3], 0  ;;  %s758_s0 = inlined_call_operand.hbm [shape: f32[8,32], index: 0, kind: input, shape index: {}]   ;;  %s759_s1 = inlined_call_operand.hbm [shape: bf16[32,128], index: 1, kind: input, shape index: {}]   ;;  %s760_s2 = inlined_call_operand.vmem [shape: f32[1,128], index: 2, kind: input, shape index: {}]   ;;  %s761_s3 = inlined_call_operand.hbm [shape: bf16[128,128], index: 3, kind: input, shape index: {}]   ;;  %s762_s4 = inlined_call_operand.vmem [shape: f32[1,128], index: 4, kind: input, shape index: {}]   ;;  %s763_s5 = inlined_call_operand.hbm [shape: bf16[128,128], index: 5, kind: input, shape index: {}]   ;;  %s764_s6 = inlined_call_operand.vmem [shape: f32[1,128], index: 6, kind: input, shape index: {}]   ;;  %s765_s7 = inlined_call_operand.hbm [shape: f32[8,128], index: 7, kind: output, shape index: {}]  }
   0x1   :  { %13 = vsyncpa [#allocation6], 0 }
   0x2   :  { %14 = vsyncpa [#allocation9], 0 }
   0x3   :  { %15 = vsyncpa [#allocation4], 0  ;;  %s628_s24 = smov [#allocation5]   ;;  %s510_s28 = scalar_lea.hbm %s759_s1, 256 }
   0x4   :  { %s31_s25 = sshll.u32 %s628_s24, 4  ;;  %p511_p0 = scmp.ne.s32.totalorder %s759_s1, %s510_s28  ;;  %s32_s25 = int_to_ptr.vmem [resolvable:$true] %s31_s25 }
   0x5   :  { %p514_p1 = scmp.lt.u32.totalorder %s510_s28, %s759_s1 }
   0x7   :  { %p516_p2 = pnand %p514_p1, %p511_p0 }
   0x9   :  { %519 = shalt.err (!%p516_p2)
}
   0xa   :  { %s520_s10 = scalar_lea.vmem %s32_s25, 256  ;;  %p525_p4 = scmp.lt.s32.totalorder %s32_s25, %s32_s25 }
   0xb   :  { %p521_p3 = scmp.ne.s32.totalorder %s32_s25, %s520_s10  ;;  %p526_p5 = scmp.lt.s32.totalorder %s520_s10, %s520_s10 }
   0xd   :  { %p527_p6 = por %p526_p5, %p525_p4 }
   0xf   :  { %p528_p7 = pnand %p527_p6, %p521_p3 }
  0x11   :  { %531 = shalt.err (!%p528_p7)
}
  0x12   :  { %s629_s11 = smov 64   ;;  %s630_s12 = smov 4  }
  0x13   :  { %37 = dma.hbm_to_vmem [thread:$0]  %s759_s1, 256, %s32_s25, [#allocation6], %s629_s11, %s629_s11, %s630_s12  }
  0x14   :  { %s631_s15 = smov [#allocation2]   ;;  %s632_s17 = smov [#allocation7]  }
  0x15   :  { %s22_s16 = sshll.u32 %s631_s15, 4  ;;  %s45_s18 = sshll.u32 %s632_s17, 4  ;;  %s23_s16 = int_to_ptr.vmem [resolvable:$true] %s22_s16  ;;  %s46_s18 = int_to_ptr.vmem [resolvable:$true] %s45_s18 }
  0x16   :  { %s532_s21 = scalar_lea.hbm %s758_s0, 128 }
  0x17   :  { %p533_p8 = scmp.ne.s32.totalorder %s758_s0, %s532_s21  ;;  %p536_p9 = scmp.lt.u32.totalorder %s532_s21, %s758_s0 }
  0x19   :  { %p538_p10 = pnand %p536_p9, %p533_p8 }
  0x1b   :  { %541 = shalt.err (!%p538_p10)
}
  0x1c   :  { %s542_s1 = scalar_lea.vmem %s23_s16, 128  ;;  %p547_p12 = scmp.lt.s32.totalorder %s23_s16, %s23_s16 }
  0x1d   :  { %p543_p11 = scmp.ne.s32.totalorder %s23_s16, %s542_s1  ;;  %p548_p13 = scmp.lt.s32.totalorder %s542_s1, %s542_s1 }
  0x1f   :  { %p549_p0 = por %p548_p13, %p547_p12 }
  0x21   :  { %p550_p1 = pnand %p549_p0, %p543_p11 }
  0x23   :  { %553 = shalt.err (!%p550_p1)
}
  0x24   :  { %25 = dma.hbm_to_vmem [thread:$0]  %s758_s0, 128, %s23_s16, [#allocation3]  }
  0x25   :  { %s554_s30 = scalar_lea.hbm %s761_s3, 1024 }
  0x26   :  { %p555_p2 = scmp.ne.s32.totalorder %s761_s3, %s554_s30  ;;  %p558_p3 = scmp.lt.u32.totalorder %s554_s30, %s761_s3 }
  0x28   :  { %p560_p4 = pnand %p558_p3, %p555_p2 }
  0x2a   :  { %563 = shalt.err (!%p560_p4)
}
  0x2b   :  { %s564_s14 = scalar_lea.vmem %s46_s18, 1024  ;;  %p569_p6 = scmp.lt.s32.totalorder %s46_s18, %s46_s18 }
  0x2c   :  { %p565_p5 = scmp.ne.s32.totalorder %s46_s18, %s564_s14  ;;  %p570_p7 = scmp.lt.s32.totalorder %s564_s14, %s564_s14 }
  0x2e   :  { %p571_p8 = por %p570_p7, %p569_p6 }
  0x30   :  { %p572_p9 = pnand %p571_p8, %p565_p5 }
  0x32   :  { %575 = shalt.err (!%p572_p9)
}
  0x33   :  { %51 = dma.hbm_to_vmem [thread:$0]  %s761_s3, 1024, %s46_s18, [#allocation6], %s629_s11, %s629_s11, %s630_s12  }
  0x34   :  { %s633_s16 = smov [#allocation8]   ;;  %s576_s21 = scalar_lea.hbm %s763_s5, 1024 }
  0x35   :  { %s59_s17 = sshll.u32 %s633_s16, 4  ;;  %p577_p10 = scmp.ne.s32.totalorder %s763_s5, %s576_s21  ;;  %s60_s17 = int_to_ptr.vmem [resolvable:$true] %s59_s17 }
  0x36   :  { %p580_p11 = scmp.lt.u32.totalorder %s576_s21, %s763_s5 }
  0x38   :  { %p582_p12 = pnand %p580_p11, %p577_p10 }
  0x3a   :  { %585 = shalt.err (!%p582_p12)
}
  0x3b   :  { %s586_s1 = scalar_lea.vmem %s60_s17, 1024  ;;  %p591_p0 = scmp.lt.s32.totalorder %s60_s17, %s60_s17 }
  0x3c   :  { %p587_p13 = scmp.ne.s32.totalorder %s60_s17, %s586_s1  ;;  %p592_p1 = scmp.lt.s32.totalorder %s586_s1, %s586_s1 }
  0x3e   :  { %p593_p2 = por %p592_p1, %p591_p0 }
  0x40   :  { %p594_p3 = pnand %p593_p2, %p587_p13 }
  0x42   :  { %597 = shalt.err (!%p594_p3)
}
  0x43   :  { %65 = dma.hbm_to_vmem [thread:$0]  %s763_s5, 1024, %s60_s17, [#allocation9], %s629_s11, %s629_s11, %s630_s12  }
  0x44   :  { %620 = dma.done.wait [#allocation3], 128  }
  0x45   :  { %621 = vsyncadd [#allocation3], 4294967168 }
  0x46   :  { %622 = dma.done.wait [#allocation6], 1280  }
  0x47   :  { %623 = vsyncadd [#allocation6], 4294966016 }
  0x48   :  { %624 = dma.done.wait [#allocation9], 1024  }
  0x49   :  { %625 = vsyncadd [#allocation9], 4294966272  ;;  %v634_v0 = vmov 0.0   ;;  %vm635_vm0 = vmmov 0   ;;  %v492_v1 = vld [vmem:[#allocation5] sm:$0xff]   ;;  %v493_v2 = vld [vmem:[#allocation5 + $0x8] sm:$0xff]  }
  0x4a   :  { %435 = vmatprep.subr.bf16.mxu0 %v634_v0  ;;  %439 = vmatprep.mubr.msk.bf16.mxu0 %vm635_vm0, %v634_v0  ;;  %v81_v3 = vld [vmem:[#allocation2] sm:$0xff]  ;;  %v494_v4 = vld [vmem:[#allocation7] sm:$0xff]   ;;  %vm106_vm1 = vcmask 261120   ;;  %v496_v7 = vld [vmem:[#allocation7 + $0x10] sm:$0xff]   ;;  %s636_s28 = smov [#allocation10]  }
  0x4b   :  { %443 = vmatprep.subr.bf16.mxu1 %v634_v0  ;;  %459 = vmatprep.mubr.msk.bf16.mxu1 %vm635_vm0, %v634_v0  ;;  %v82_v5 = vpack.c.bf16 %v81_v3, %v81_v3  ;;  %v495_v6 = vld [vmem:[#allocation7 + $0x8] sm:$0xff]   ;;  %v497_v8 = vld [vmem:[#allocation7 + $0x18] sm:$0xff]   ;;  %v498_v9 = vld [vmem:[#allocation7 + $0x20] sm:$0xff]   ;;  %s381_s29 = sshll.u32 %s636_s28, 4  ;;  %s382_s29 = int_to_ptr.vmem [resolvable:$true] %s381_s29 }
  0x4c   :  { %436 = vmatpush3.bf16.msra.mxu0 %v492_v1  ;;  %444 = vmatpush3.bf16.msra.mxu1 %v494_v4  ;;  %v499_v10 = vld [vmem:[#allocation7 + $0x28] sm:$0xff]   ;;  %v500_v11 = vld [vmem:[#allocation7 + $0x30] sm:$0xff]   ;;  %v501_v12 = vld [vmem:[#allocation7 + $0x38] sm:$0xff]   ;;  %p603_p5 = scmp.lt.s32.totalorder %s382_s29, %s382_s29 }
  0x4d   :  { %437 = vmatprep.subr.bf16.mxu0 %v634_v0  ;;  %445 = vmatprep.subr.bf16.mxu1 %v634_v0  ;;  %v502_v13 = vld [vmem:[#allocation8] sm:$0xff]   ;;  %v503_v14 = vld [vmem:[#allocation8 + $0x8] sm:$0xff]   ;;  %v504_v15 = vld [vmem:[#allocation8 + $0x10] sm:$0xff]  }
  0x4e   :  { %v505_v16 = vld [vmem:[#allocation8 + $0x18] sm:$0xff]   ;;  %v506_v17 = vld [vmem:[#allocation8 + $0x20] sm:$0xff]   ;;  %v507_v18 = vld [vmem:[#allocation8 + $0x28] sm:$0xff]  }
  0x4f   :  { %v508_v19 = vld [vmem:[#allocation8 + $0x30] sm:$0xff]   ;;  %v392_v20 = vld [vmem:[%s760_s2] ss:$0 sm:$0xff]  ;;  %v509_v27 = vld [vmem:[#allocation8 + $0x38] sm:$0xff]  }
  0x50   :  { %438 = vmatpush3.bf16.msra.mxu0 %v493_v2  ;;  %446 = vmatpush3.bf16.msra.mxu1 %v495_v6  ;;  %v396_v28 = vld [vmem:[%s762_s4] ss:$0 sm:$0xff]  ;;  %s598_s4 = scalar_lea.vmem %s382_s29, 128 }
  0x51   :  { %463 = vmatprep.subr.bf16.mxu0 %v634_v0  ;;  %447 = vmatprep.subr.bf16.mxu1 %v634_v0  ;;  %v405_v35 = vld [vmem:[%s764_s6] ss:$0 sm:$0xff]  ;;  %p599_p4 = scmp.ne.s32.totalorder %s382_s29, %s598_s4  ;;  %p604_p6 = scmp.lt.s32.totalorder %s598_s4, %s598_s4 }
  0x53   :  { %440 = vmatmul.mubr.msk.bf16.vlgmr.msra.gmra.mrb[0].mxu0 %vm106_vm1, %v82_v5  ;;  %p605_p7 = por %p604_p6, %p603_p5 }
  0x54   :  { %479 = vmatprep.mubr.msk.bf16.mxu0 %vm635_vm0, %v634_v0  ;;  %448 = vmatpush3.bf16.msra.mxu1 %v496_v7 }
  0x55   :  { %449 = vmatprep.subr.bf16.mxu1 %v634_v0  ;;  %464 = vmatpush3.bf16.msra.mxu0 %v502_v13  ;;  %p606_p8 = pnand %p605_p7, %p599_p4 }
  0x56   :  { %465 = vmatprep.subr.bf16.mxu0 %v634_v0 }
  0x58   :  { %450 = vmatpush3.bf16.msra.mxu1 %v497_v8 }
  0x59   :  { %451 = vmatprep.subr.bf16.mxu1 %v634_v0  ;;  %466 = vmatpush3.bf16.msra.mxu0 %v503_v14 }
  0x5a   :  { %467 = vmatprep.subr.bf16.mxu0 %v634_v0 }
  0x5c   :  { %452 = vmatpush3.bf16.msra.mxu1 %v498_v9 }
  0x5d   :  { %453 = vmatprep.subr.bf16.mxu1 %v634_v0  ;;  %468 = vmatpush3.bf16.msra.mxu0 %v504_v15 }
  0x5e   :  { %469 = vmatprep.subr.bf16.mxu0 %v634_v0 }
  0x60   :  { %454 = vmatpush3.bf16.msra.mxu1 %v499_v10 }
  0x61   :  { %455 = vmatprep.subr.bf16.mxu1 %v634_v0  ;;  %470 = vmatpush3.bf16.msra.mxu0 %v505_v16 }
  0x62   :  { %471 = vmatprep.subr.bf16.mxu0 %v634_v0 }
  0x64   :  { %456 = vmatpush3.bf16.msra.mxu1 %v500_v11 }
  0x65   :  { %457 = vmatprep.subr.bf16.mxu1 %v634_v0  ;;  %472 = vmatpush3.bf16.msra.mxu0 %v506_v17 }
  0x66   :  { %473 = vmatprep.subr.bf16.mxu0 %v634_v0 }
  0x68   :  { %458 = vmatpush3.bf16.msra.mxu1 %v501_v12 }
  0x69   :  { %474 = vmatpush3.bf16.msra.mxu0 %v507_v18 }
  0x6a   :  { %475 = vmatprep.subr.bf16.mxu0 %v634_v0 }
  0x6d   :  { %476 = vmatpush3.bf16.msra.mxu0 %v508_v19 }
  0x6e   :  { %477 = vmatprep.subr.bf16.mxu0 %v634_v0 }
  0x71   :  { %478 = vmatpush3.bf16.msra.mxu0 %v509_v27 }
 0x126   :  { %v144_v21 = vpop.f32.mrb[0].mxu0 }
 0x127   :  { %v145_v22 = vadd.f32 %v392_v20, %v144_v21  ;;  %v441_v23 = vpop.f32.mrb[1].mxu0 }
 0x128   :  { %v147_v24 = vpop.f32.mrb[2].mxu0 }
 0x129   :  { %v150_v25 = vpack.c.bf16 %v145_v22, %v145_v22  ;;  %v442_v26 = vpop.f32.mrb[3].mxu0 }
 0x12b   :  { %460 = vmatmul.mubr.bf16.vlgmr.msra.gmra.mrb[0].mxu1 %v150_v25 }
 0x1fe   :  { %v256_v29 = vpop.f32.mrb[0].mxu1 }
 0x1ff   :  { %v257_v30 = vadd.f32 %v396_v28, %v256_v29  ;;  %v461_v31 = vpop.f32.mrb[1].mxu1 }
 0x200   :  { %v259_v32 = vpop.f32.mrb[2].mxu1 }
 0x201   :  { %v262_v33 = vpack.c.bf16 %v257_v30, %v257_v30  ;;  %v462_v34 = vpop.f32.mrb[3].mxu1 }
 0x203   :  { %480 = vmatmul.mubr.bf16.vlgmr.msra.gmra.mrb[4].mxu0 %v262_v33 }
 0x2d6   :  { %v368_v36 = vpop.f32.mrb[4].mxu0 }
 0x2d7   :  { %v369_v37 = vadd.f32 %v405_v35, %v368_v36  ;;  %v481_v38 = vpop.f32.mrb[5].mxu0 }
 0x2d8   :  { %v371_v39 = vpop.f32.mrb[6].mxu0 }
 0x2d9   :  { %374 = vst [vmem:[#allocation10] sm:$0xff] %v369_v37  ;;  %v482_v40 = vpop.f32.mrb[7].mxu0 }
 0x2da   :  { %609 = shalt.err (!%p606_p8)
}
 0x2db   :  { %s610_s6 = scalar_lea.hbm %s765_s7, 128 }
 0x2dc   :  { %p611_p9 = scmp.ne.s32.totalorder %s765_s7, %s610_s6  ;;  %p614_p10 = scmp.lt.u32.totalorder %s610_s6, %s765_s7 }
 0x2de   :  { %p616_p11 = pnand %p614_p10, %p611_p9 }
 0x2e0   :  { %619 = shalt.err (!%p616_p11)
}
 0x2e1   :  { %384 = dma.vmem_to_hbm [thread:$0]  %s382_s29, 128, %s765_s7, [#allocation4]  }
 0x2e2   :  { %626 = dma.done.wait [#allocation4], 128  }
 0x2e3   :  { %627 = vsyncadd [#allocation4], 4294967168 }
 0x2e4   :  { %388 = vsyncpa [#allocation3], 1 }
 0x2e5   :  { %389 = vsyncpa [#allocation6], 1 }
 0x2e6   :  { %390 = vsyncpa [#allocation9], 1 }
 0x2e7   :  { %391 = vsyncpa [#allocation4], 1 }

</bundles_post_ra>
